<compile_context>
chip_gen: v5e
topology: v5e:2x2
jax: 0.10.0
libtpu: 0.0.40
codegen_flags: <defaults>
</compile_context>

<pallas_src>
import functools

import jax
import jax.numpy as jnp
from jax.experimental import pallas as pl
from jax.experimental.pallas import tpu as pltpu


def _platt_kernel(s_ref, x_ref, o_ref, *, clip_lo=None, clip_hi=None):
    # s_ref: (2,) f32 in SMEM = [w, b]
    # x_ref / o_ref: (block_rows, lanes) tiles in VMEM (native / output dtype).
    w = s_ref[0]
    b = s_ref[1]
    x = x_ref[...].astype(jnp.float32)            # upcast in-register (VPU, free)
    if clip_lo is not None:                       # statically fused clip (transform path)
        x = jnp.maximum(x, jnp.float32(clip_lo))
    if clip_hi is not None:
        x = jnp.minimum(x, jnp.float32(clip_hi))
    o_ref[...] = (w * x + b).astype(o_ref.dtype)


def _round_up(x, m):
    return pl.cdiv(x, m) * m


def _pick_lanes(n):
    """Widest lane dim (multiple of 128) that divides n; else 128 + tiny pad."""
    for lanes in (1024, 512, 256, 128):
        if n % lanes == 0:
            return lanes, False
    return 128, True


def _pick_tiling(rows, step_bytes_per_row, sub, target_step_bytes, min_split_bytes):
    """Choose (block_rows, grid) for a (rows, lanes) slab.

    Blocks are sized by bytes (in + out traffic per grid step) towards
    target_step_bytes, rounded to the sublane multiple `sub`.  The last block
    may be partial (Pallas masks it).  Small inputs run as a single block
    (block_shape == full array dims is always legal); inputs big enough to be
    worth it are split into >=2 blocks so both v7x TensorCores get work.
    """
    total_bytes = rows * step_bytes_per_row
    if rows <= sub or total_bytes <= 2 * min_split_bytes:
        return rows, 1
    block = max(sub, (target_step_bytes // step_bytes_per_row) // sub * sub)
    if rows <= block:
        # Fits one block but is big enough that two halves are still decent
        # blocks: split so v7x's two TensorCores both stream data.
        block = _round_up(pl.cdiv(rows, 2), sub)
    return block, pl.cdiv(rows, block)


def platt_forward(probs, w, b, *, clip_lo=None, clip_hi=None, out_dtype=None,
                  target_step_bytes=8 << 20, min_split_bytes=1 << 20,
                  donate_input=False):
    """Equivalent of PlattScaling.forward: w * probs + b, elementwise.

    clip_lo/clip_hi (Python floats) fuse a clip into the kernel body (used by
    the transform() path).  Floating inputs keep their dtype in HBM; the math
    is always f32 in-register.  out_dtype overrides the output dtype (e.g.
    f32 outputs from bf16 inputs for .float() semantics).
    """
    probs = jnp.asarray(probs)
    orig_shape = probs.shape
    if not jnp.issubdtype(probs.dtype, jnp.floating):
        probs = probs.astype(jnp.float32)
    in_dtype = probs.dtype
    out_dtype = jnp.dtype(in_dtype if out_dtype is None else out_dtype)

    flat = probs.reshape(-1)
    n = flat.shape[0]
    if n == 0:
        return jnp.zeros(orig_shape, out_dtype)

    lanes, needs_pad = _pick_lanes(n)
    if needs_pad:
        padded_n = _round_up(n, lanes)
        flat = jnp.pad(flat, (0, padded_n - n))     # < 128 extra elements only
    else:
        padded_n = n                                 # zero-copy reshape path
    rows = padded_n // lanes
    x2d = flat.reshape(rows, lanes)

    in_item = jnp.dtype(in_dtype).itemsize
    out_item = out_dtype.itemsize
    sub = 8 * max(1, 4 // in_item)                   # f32 -> 8, bf16 -> 16, 8-bit -> 32
    block_rows, grid_size = _pick_tiling(
        rows, lanes * (in_item + out_item), sub, target_step_bytes, min_split_bytes)

    scalars = jnp.array([w, b], dtype=jnp.float32)
    kernel = functools.partial(_platt_kernel, clip_lo=clip_lo, clip_hi=clip_hi)

    aliases = {1: 0} if (donate_input and out_dtype == in_dtype) else {}

    out = pl.pallas_call(
        kernel,
        out_shape=jax.ShapeDtypeStruct((rows, lanes), out_dtype),
        grid_spec=pltpu.PrefetchScalarGridSpec(
            num_scalar_prefetch=0,
            grid=(grid_size,),
            in_specs=[
                pl.BlockSpec(memory_space=pltpu.MemorySpace.SMEM),   # [w, b]
                pl.BlockSpec((block_rows, lanes), lambda i: (i, 0)),
            ],
            out_specs=pl.BlockSpec((block_rows, lanes), lambda i: (i, 0)),
        ),
        compiler_params=pltpu.CompilerParams(
            dimension_semantics=("parallel",),
            vmem_limit_bytes=32 * 1024 * 1024,
        ),
        input_output_aliases=aliases,
    )(scalars, x2d)

    out = out.reshape(-1)
    if padded_n != n:
        out = out[:n]
    return out.reshape(orig_shape)


def platt_transform(probs, w, b, epsilon=0.01):
    """Equivalent of PlattScaling.transform (eval path).

    preprocess_probs (flatten + .float() + clip) is folded into the kernel:
    the input stays in its native dtype in HBM, the upcast happens in-register
    and the clip is fused as static constants; the output is f32 (matching
    PyTorch's .float()), returned raveled.
    """
    out = platt_forward(probs, w, b, clip_lo=float(epsilon),
                        clip_hi=float(1.0 - epsilon), out_dtype=jnp.float32)
    return out.reshape(-1)


# TODO(synk): Calibrator.fit (LBFGS + BCELoss training loop) and
# save_model/load_model are host-side torch utilities, not kernel work.


if __name__ == "__main__":
    key = jax.random.PRNGKey(0)
    # Non-trivial parameter values to exercise the affine (module init is w=1, b=0).
    w = jnp.float32(1.5)
    b = jnp.float32(-0.25)

    # Small probability-map-like input, NCHW-shaped.
    x = jax.random.uniform(key, (2, 4, 16, 16), dtype=jnp.float32)

    # forward(): w * probs + b, same shape/dtype out.
    y = jax.block_until_ready(platt_forward(x, w, b))
    assert y.shape == x.shape and y.dtype == x.dtype
    assert jnp.allclose(y, w * x + b, atol=1e-6)

    # transform(): preprocess (flatten + .float() + clip, fused) then forward, raveled.
    t = jax.block_until_ready(platt_transform(x, w, b))
    ref_t = w * jnp.clip(x.reshape(-1), 0.01, 0.99) + b
    assert t.shape == (x.size,) and t.dtype == jnp.float32
    assert jnp.allclose(t, ref_t, atol=1e-6)

    # Unaligned element count -> exercises the (tiny, <128-element) tail-pad path.
    x2 = jax.random.uniform(jax.random.PRNGKey(1), (7, 33), dtype=jnp.float32)
    y2 = jax.block_until_ready(platt_forward(x2, w, b))
    assert jnp.allclose(y2, w * x2 + b, atol=1e-6)

    # bf16 input stays bf16 in HBM for forward(); f32 math in-register.
    x3 = jax.random.uniform(jax.random.PRNGKey(2), (4, 4, 16, 16)).astype(jnp.bfloat16)
    y3 = jax.block_until_ready(platt_forward(x3, w, b))
    ref3 = (jnp.float32(w) * x3.astype(jnp.float32) + jnp.float32(b)).astype(jnp.bfloat16)
    assert y3.dtype == jnp.bfloat16
    assert jnp.allclose(y3.astype(jnp.float32), ref3.astype(jnp.float32), atol=1e-2)

    # transform() on bf16: no wrapper-side f32 cast; kernel emits f32 directly.
    t3 = jax.block_until_ready(platt_transform(x3, w, b))
    ref_t3 = w * jnp.clip(x3.astype(jnp.float32).reshape(-1), 0.01, 0.99) + b
    assert t3.dtype == jnp.float32
    assert jnp.allclose(t3, ref_t3, atol=1e-5)

    # Force a multi-block grid with a ragged (masked) last block at small shapes
    # by shrinking the byte targets -- exercises the no-pad partial-block path.
    x4 = jax.random.uniform(jax.random.PRNGKey(3), (300, 256), dtype=jnp.float32)
    y4 = jax.block_until_ready(
        platt_forward(x4, w, b, target_step_bytes=64 * 1024, min_split_bytes=16 * 1024))
    assert jnp.allclose(y4, w * x4 + b, atol=1e-6)

    print("KERNEL_OK")
</pallas_src>

<mosaic_0001>
module attributes {stable_mosaic.version = 11 : i64} {
  func.func @_platt_kernel(%arg0: i32, %arg1: memref<2xf32, #tpu.memory_space<smem>>, %arg2: memref<2x1024xf32, #tpu.memory_space<vmem>>, %arg3: memref<2x1024xf32, #tpu.memory_space<vmem>>) attributes {dimension_semantics = [#tpu.dimension_semantics<parallel>], iteration_bounds = array<i64: 1>, scalar_prefetch = 0 : i64, scratch_operands = 0 : i64, tpu.core_type = #tpu.core_type<tc>, window_params = [{transform_indices = @transform_0, window_bounds = array<i64: 2>}, {transform_indices = @transform_1, window_bounds = array<i64: 2, 1024>}, {transform_indices = @transform_2, window_bounds = array<i64: 2, 1024>}]} {
    %c0 = arith.constant 0 : index
    %0 = memref.load %arg1[%c0] : memref<2xf32, #tpu.memory_space<smem>>
    %c1 = arith.constant 1 : index
    %1 = memref.load %arg1[%c1] : memref<2xf32, #tpu.memory_space<smem>>
    %c0_0 = arith.constant 0 : index
    %c0_1 = arith.constant 0 : index
    %2 = vector.load %arg2[%c0_0, %c0_1] : memref<2x1024xf32, #tpu.memory_space<vmem>>, vector<2x1024xf32>
    %3 = vector.broadcast %0 : f32 to vector<2x1024xf32>
    %4 = arith.mulf %3, %2 : vector<2x1024xf32>
    %5 = vector.broadcast %1 : f32 to vector<2x1024xf32>
    %6 = arith.addf %4, %5 : vector<2x1024xf32>
    %c0_2 = arith.constant 0 : index
    %c0_3 = arith.constant 0 : index
    %7 = vector.load %arg3[%c0_2, %c0_3] : memref<2x1024xf32, #tpu.memory_space<vmem>>, vector<2x1024xf32>
    tpu.vector_store %arg3[%c0_2, %c0_3], %6 {strides = array<i32>} : memref<2x1024xf32, #tpu.memory_space<vmem>>, vector<2x1024xf32>,
    return
  }
  func.func @transform_0(%arg0: i32) -> i32 {
    %c0_i32 = arith.constant 0 : i32
    %c0_i32_0 = arith.constant 0 : i32
    return %c0_i32 : i32
  }
  func.func @transform_1(%arg0: i32) -> (i32, i32) {
    %c0_i32 = arith.constant 0 : i32
    %c0_i32_0 = arith.constant 0 : i32
    return %arg0, %c0_i32 : i32, i32
  }
  func.func @transform_2(%arg0: i32) -> (i32, i32) {
    %c0_i32 = arith.constant 0 : i32
    %c0_i32_0 = arith.constant 0 : i32
    return %arg0, %c0_i32 : i32, i32
  }
}

</mosaic_0001>

<bundles_post_ra>
// kernel: tpu_custom_call.1
= control target key start
LH: loop header
LB: loop body
LE: loop exit
PB: predicated region body
PF: predicated region fallthrough
CT: control target
= control target key end

     0   :  { %7 = vsyncpa [#allocation5], 0  ;;  %s166_s0 = inlined_call_operand.hbm [shape: f32[2], index: 0, kind: input, shape index: {}]   ;;  %s167_s1 = inlined_call_operand.hbm [shape: f32[2,1024], index: 1, kind: input, shape index: {}]   ;;  %s168_s2 = inlined_call_operand.hbm [shape: f32[2,1024], index: 2, kind: output, shape index: {}]  }
   0x1   :  { %8 = vsyncpa [#allocation3], 0 }
   0x2   :  { %9 = vsyncpa [#allocation4], 0  ;;  %s15_s11 = sshll.u32 %s166_s0, 4  ;;  %s24_s14 = sshll.u32 %s167_s1, 4  ;;  %s16_s11 = int_to_ptr.hbm [resolvable:$true] %s15_s11  ;;  %s25_s14 = int_to_ptr.hbm [resolvable:$true] %s24_s14 }
   0x3   :  { %s139_s15 = smov [#allocation2]   ;;  %s140_s16 = smov [#allocation6]  }
   0x4   :  { %18 = dma.hbm_to_smem %s16_s11, 16, %s139_s15, [#allocation5]  }
   0x5   :  { %s26_s17 = sshll.u32 %s140_s16, 4  ;;  %s27_s17 = int_to_ptr.vmem [resolvable:$true] %s26_s17 }
   0x6   :  { %29 = dma.hbm_to_vmem [thread:$0]  %s25_s14, 256, %s27_s17, [#allocation3]  }
   0x7   :  { %133 = dma.done.wait [#allocation5], 16  }
   0x8   :  { %134 = vsyncadd [#allocation5], 4294967280 }
   0x9   :  { %135 = dma.done.wait [#allocation3], 256  }
   0xa   :  { %136 = vsyncadd [#allocation3], 4294967040 }
   0xb   :  { %38 = sfence }
   0xc   :  { %s39_s18 = sld [smem:[#allocation2]]  ;;  %v41_v0 = vld [vmem:[#allocation6] sm:$0xff]  ;;  %v42_v1 = vld [vmem:[#allocation6 + $0x8] sm:$0xff]  ;;  %s141_s0 = smov [#allocation7]  }
   0xd   :  { %s69_s19 = sld [smem:[#allocation2 + $0x1]]  ;;  %s56_s1 = sshll.u32 %s141_s0, 4  ;;  %s57_s1 = int_to_ptr.vmem [resolvable:$true] %s56_s1 }
   0xe   :  { %s58_s22 = sshll.u32 %s168_s2, 4  ;;  %s59_s22 = int_to_ptr.hbm [resolvable:$true] %s58_s22 }
  0x12   :  { %v43_v2 = vstv %s39_s18 }
  0x13   :  { %v44_v3 = vmul.f32 %v43_v2, %v41_v0  ;;  %v46_v4 = vstv %s69_s19  ;;  %v45_v5 = vmul.f32 %v43_v2, %v42_v1 }
  0x15   :  { %v47_v6 = vadd.f32 %v46_v4, %v44_v3  ;;  %v48_v7 = vadd.f32 %v46_v4, %v45_v5 }
  0x17   :  { %49 = vst [vmem:[#allocation7] sm:$0xff] %v47_v6 }
  0x18   :  { %50 = vst [vmem:[#allocation7 + $0x8] sm:$0xff] %v48_v7 }
  0x19   :  { %61 = dma.vmem_to_hbm [thread:$0]  %s57_s1, 256, %s59_s22, [#allocation4]  }
  0x1a   :  { %137 = dma.done.wait [#allocation4], 256  }
  0x1b   :  { %138 = vsyncadd [#allocation4], 4294967040 }
  0x1c   :  { %66 = vsyncpa [#allocation3], 1 }
  0x1d   :  { %67 = vsyncpa [#allocation4], 1 }
  0x1e   :  { %68 = vsyncpa [#allocation5], 1 }

</bundles_post_ra>
